<compile_context>
chip_gen: v6e
topology: v6e:2x2x1
jax: 0.10.0
libtpu: 0.0.40
codegen_flags: <defaults>
</compile_context>

<pallas_src>
import functools

import jax
import jax.numpy as jnp
from jax import lax
from jax.experimental import pallas as pl
from jax.experimental.pallas import tpu as pltpu


def _triplet_tile_kernel(xl_ref, xr_ref, sqc_ref, sqr_ref, tcol_ref, trow_ref,
                         o_ref, *, margin, n_valid, precision):
    # xl_ref:   (TM, d_pad)    gram-dtype anchor rows for this tile
    # xr_ref:   (N_pad, d_pad) gram-dtype resident operand
    # sqc_ref:  (TM, 1) f32 ; sqr_ref: (1, N_pad) f32   squared norms
    # tcol_ref: (TM, 1) i32 ; trow_ref: (1, N_pad) i32  labels (pad label = -1)
    # o_ref:    (1, 1, 1) f32 per-tile partial hinge sum
    tm = xl_ref.shape[0]
    n_pad = xr_ref.shape[0]
    i = pl.program_id(0)

    # --- squared pairwise distances for this anchor tile: (TM, N_pad) ---
    gram = lax.dot_general(
        xl_ref[...], xr_ref[...], (((1,), (1,)), ((), ())),
        preferred_element_type=jnp.float32, precision=precision)
    dist2 = sqc_ref[...] + sqr_ref[...] - 2.0 * gram              # (TM, N_pad) f32

    # --- masks fused into the candidate selects (no (N,N) iota slabs) ---
    same = tcol_ref[...] == trow_ref[...]                         # (TM, N_pad)
    row_ids = i * tm + lax.broadcasted_iota(jnp.int32, (tm, 1), 0)      # (TM, 1)
    col_ids = lax.broadcasted_iota(jnp.int32, (1, n_pad), 1)            # (1, N_pad)
    col_valid = col_ids < n_valid                                  # (1, N_pad)

    neg_inf = jnp.float32(-jnp.inf)
    pos_inf = jnp.float32(jnp.inf)

    # hard positive: max squared-dist over same-label (excl. self, excl. pad)
    pos_mask = jnp.logical_and(jnp.logical_and(same, row_ids != col_ids), col_valid)
    ap2 = jnp.max(jnp.where(pos_mask, dist2, neg_inf), axis=1, keepdims=True)
    dist_ap = jnp.where(ap2 > neg_inf, jnp.sqrt(jnp.maximum(ap2, 1e-12)), 0.0)

    # hard negative: min squared-dist over different-label (excl. pad)
    neg_mask = jnp.logical_and(jnp.logical_not(same), col_valid)
    an2 = jnp.min(jnp.where(neg_mask, dist2, pos_inf), axis=1, keepdims=True)
    dist_an = jnp.sqrt(jnp.maximum(an2, 1e-12))                    # +inf stays +inf

    # MarginRankingLoss(margin)(dist_an, dist_ap, 1): relu(ap - an + m)
    hinge = jnp.maximum(dist_ap - dist_an + jnp.float32(margin), 0.0)  # (TM, 1)
    hinge = jnp.where(row_ids < n_valid, hinge, 0.0)               # drop padded anchors
    o_ref[...] = jnp.sum(hinge).reshape(1, 1, 1)


def _round_up(x, m):
    return (x + m - 1) // m * m


def ori_triplet_loss(inputs, targets, margin=0.3):
    """inputs: (N, d) float array; targets: (N,) integer array. Returns scalar f32."""
    n, d = inputs.shape
    lane = 128
    n_pad = max(_round_up(n, lane), lane)
    d_pad = max(_round_up(d, lane), lane)
    tm = min(128, n_pad)                 # multiple of 8 sublanes; lane-dense (TM, N_pad) slabs
    num_tiles = n_pad // tm

    # Gram precision by regime: bf16 operands when the MXU binds (large d) or the
    # input is already half precision; otherwise f32 + HIGHEST (fidelity for free
    # in the VPU-bound small-d regime).
    use_bf16 = (d >= 256) or (jnp.dtype(inputs.dtype).itemsize <= 2)
    op_dtype = jnp.bfloat16 if use_bf16 else jnp.float32
    precision = None if use_bf16 else lax.Precision.HIGHEST

    # Cheap XLA prologue: f32 squared norms (no force-cast of the big operand).
    sq = jnp.sum(jnp.square(inputs.astype(jnp.float32)), axis=1)        # (n,)

    x_op = jnp.pad(inputs.astype(op_dtype), ((0, n_pad - n), (0, d_pad - d)))
    sq_pad = jnp.pad(sq, (0, n_pad - n))
    sq_col = sq_pad.reshape(n_pad, 1)
    sq_row = sq_pad.reshape(1, n_pad)
    t_pad = jnp.pad(targets.astype(jnp.int32), (0, n_pad - n), constant_values=-1)
    t_col = t_pad.reshape(n_pad, 1)
    t_row = t_pad.reshape(1, n_pad)

    # Generation-aware VMEM budget with headroom below physical capacity.
    try:
        cap = int(pltpu.get_tpu_info().vmem_capacity_bytes)  # 64 MiB v7x, 128 MiB v5e/v6e
    except Exception:
        cap = 64 << 20
    isz = jnp.dtype(op_dtype).itemsize
    est = (2 * n_pad * d_pad * isz       # resident gram operand (worst case 2 buffers)
           + 2 * tm * d_pad * isz        # double-buffered LHS stream
           + 12 * tm * n_pad * 4         # (TM, N_pad) f32/bool intermediates
           + 8 * n_pad * 4)              # norm / label vectors
    vmem_bytes = int(min(int(cap * 0.85), max(32 << 20, est)))

    partials = pl.pallas_call(
        functools.partial(_triplet_tile_kernel, margin=float(margin),
                          n_valid=n, precision=precision),
        out_shape=jax.ShapeDtypeStruct((num_tiles, 1, 1), jnp.float32),
        grid=(num_tiles,),
        in_specs=[
            pl.BlockSpec((tm, d_pad), lambda i: (i, 0)),       # streamed anchor rows
            pl.BlockSpec((n_pad, d_pad), lambda i: (0, 0)),    # resident gram operand
            pl.BlockSpec((tm, 1), lambda i: (i, 0)),           # anchor squared norms
            pl.BlockSpec((1, n_pad), lambda i: (0, 0)),        # all squared norms
            pl.BlockSpec((tm, 1), lambda i: (i, 0)),           # anchor labels
            pl.BlockSpec((1, n_pad), lambda i: (0, 0)),        # all labels
        ],
        out_specs=pl.BlockSpec((1, 1, 1), lambda i: (i, 0, 0)),
        compiler_params=pltpu.CompilerParams(
            dimension_semantics=("parallel",),
            vmem_limit_bytes=vmem_bytes),
    )(x_op, x_op, sq_col, sq_row, t_col, t_row)

    loss = jnp.sum(partials) / jnp.float32(n)
    # NaN/inf guard from the PyTorch module (plain-JAX glue).
    loss = jnp.where(jnp.isnan(loss) | jnp.isinf(loss), jnp.float32(0.0), loss)
    return loss


if __name__ == "__main__":
    key = jax.random.PRNGKey(0)
    N, D = 8, 32
    inputs = jax.random.normal(key, (N, D), dtype=jnp.float32)
    # 4 identities x 2 samples each -> every anchor has a positive and negatives.
    targets = jnp.array([0, 0, 1, 1, 2, 2, 3, 3], dtype=jnp.int32)

    loss = ori_triplet_loss(inputs, targets, margin=0.3)
    jax.block_until_ready(loss)
    print("KERNEL_OK")
</pallas_src>

<mosaic_0001>
module attributes {stable_mosaic.version = 11 : i64} {
  func.func @_triplet_tile_kernel(%arg0: i32, %arg1: memref<128x128xf32, #tpu.memory_space<vmem>>, %arg2: memref<128x128xf32, #tpu.memory_space<vmem>>, %arg3: memref<128x1xf32, #tpu.memory_space<vmem>>, %arg4: memref<1x128xf32, #tpu.memory_space<vmem>>, %arg5: memref<128x1xi32, #tpu.memory_space<vmem>>, %arg6: memref<1x128xi32, #tpu.memory_space<vmem>>, %arg7: memref<1x1x1xf32, #tpu.memory_space<vmem>>) attributes {dimension_semantics = [#tpu.dimension_semantics<parallel>], iteration_bounds = array<i64: 1>, scalar_prefetch = 0 : i64, scratch_operands = 0 : i64, tpu.core_type = #tpu.core_type<tc>, window_params = [{transform_indices = @transform_0, window_bounds = array<i64: 128, 128>}, {pipeline_mode = #tpu.pipeline_mode<synchronous>, transform_indices = @transform_1, window_bounds = array<i64: 128, 128>}, {transform_indices = @transform_2, window_bounds = array<i64: 128, 1>}, {pipeline_mode = #tpu.pipeline_mode<synchronous>, transform_indices = @transform_3, window_bounds = array<i64: 1, 128>}, {transform_indices = @transform_4, window_bounds = array<i64: 128, 1>}, {pipeline_mode = #tpu.pipeline_mode<synchronous>, transform_indices = @transform_5, window_bounds = array<i64: 1, 128>}, {transform_indices = @transform_6, window_bounds = array<i64: 1, 1, 1>}]} {
    %c0 = arith.constant 0 : index
    %c0_0 = arith.constant 0 : index
    %0 = vector.load %arg1[%c0, %c0_0] : memref<128x128xf32, #tpu.memory_space<vmem>>, vector<128x128xf32>
    %c0_1 = arith.constant 0 : index
    %c0_2 = arith.constant 0 : index
    %1 = vector.load %arg2[%c0_1, %c0_2] : memref<128x128xf32, #tpu.memory_space<vmem>>, vector<128x128xf32>
    %cst = arith.constant dense<0.000000e+00> : vector<128x128xf32>
    %2 = tpu.matmul %0, %1, %cst {dimension_numbers = #tpu.dot_dimension_numbers<[1], [1], [0], [0], [0, 0, 1, 0], [], []>, precision = #tpu.contract_precision<fp32>} : vector<128x128xf32>, vector<128x128xf32>, vector<128x128xf32> -> vector<128x128xf32>
    %c0_3 = arith.constant 0 : index
    %c0_4 = arith.constant 0 : index
    %3 = vector.load %arg3[%c0_3, %c0_4] : memref<128x1xf32, #tpu.memory_space<vmem>>, vector<128x1xf32>
    %c0_5 = arith.constant 0 : index
    %c0_6 = arith.constant 0 : index
    %4 = vector.load %arg4[%c0_5, %c0_6] : memref<1x128xf32, #tpu.memory_space<vmem>>, vector<1x128xf32>
    %5 = vector.broadcast %3 : vector<128x1xf32> to vector<128x128xf32>
    %6 = vector.broadcast %4 : vector<1x128xf32> to vector<128x128xf32>
    %7 = arith.addf %5, %6 : vector<128x128xf32>
    %cst_7 = arith.constant 2.000000e+00 : f32
    %8 = vector.broadcast %cst_7 : f32 to vector<128x128xf32>
    %9 = arith.mulf %8, %2 : vector<128x128xf32>
    %10 = arith.subf %7, %9 : vector<128x128xf32>
    %c0_8 = arith.constant 0 : index
    %c0_9 = arith.constant 0 : index
    %11 = vector.load %arg5[%c0_8, %c0_9] : memref<128x1xi32, #tpu.memory_space<vmem>>, vector<128x1xi32>
    %c0_10 = arith.constant 0 : index
    %c0_11 = arith.constant 0 : index
    %12 = vector.load %arg6[%c0_10, %c0_11] : memref<1x128xi32, #tpu.memory_space<vmem>>, vector<1x128xi32>
    %13 = vector.broadcast %11 : vector<128x1xi32> to vector<128x128xi32>
    %14 = vector.broadcast %12 : vector<1x128xi32> to vector<128x128xi32>
    %15 = arith.cmpi eq, %13, %14 : vector<128x128xi32>
    %c128_i32 = arith.constant 128 : i32
    %16 = arith.muli %arg0, %c128_i32 : i32
    %17 = tpu.iota {dimensions = array<i32: 0>} : vector<128x1xi32>
    %18 = vector.broadcast %16 : i32 to vector<128x1xi32>
    %19 = arith.addi %18, %17 : vector<128x1xi32>
    %20 = tpu.iota {dimensions = array<i32: 1>} : vector<1x128xi32>
    %c8_i32 = arith.constant 8 : i32
    %21 = vector.broadcast %c8_i32 : i32 to vector<1x128xi32>
    %22 = arith.cmpi slt, %20, %21 : vector<1x128xi32>
    %23 = vector.broadcast %19 : vector<128x1xi32> to vector<128x128xi32>
    %24 = vector.broadcast %20 : vector<1x128xi32> to vector<128x128xi32>
    %25 = arith.cmpi ne, %23, %24 : vector<128x128xi32>
    %26 = arith.andi %15, %25 : vector<128x128xi1>
    %27 = vector.broadcast %22 : vector<1x128xi1> to vector<128x128xi1>
    %28 = arith.andi %26, %27 : vector<128x128xi1>
    %cst_12 = arith.constant 0xFF800000 : f32
    %29 = vector.broadcast %cst_12 : f32 to vector<128x128xf32>
    %30 = arith.select %28, %10, %29 : vector<128x128xi1>, vector<128x128xf32>
    %cst_13 = arith.constant dense<0xFF800000> : vector<128xf32>
    %31 = vector.multi_reduction <maximumf>, %30, %cst_13 [1] : vector<128x128xf32> to vector<128xf32>
    %32 = vector.shape_cast %31 : vector<128xf32> to vector<128x1xf32>
    %cst_14 = arith.constant 0xFF800000 : f32
    %33 = vector.broadcast %cst_14 : f32 to vector<128x1xf32>
    %34 = arith.cmpf ogt, %32, %33 : vector<128x1xf32>
    %cst_15 = arith.constant 9.99999996E-13 : f32
    %35 = vector.broadcast %cst_15 : f32 to vector<128x1xf32>
    %36 = arith.maximumf %32, %35 : vector<128x1xf32>
    %37 = math.sqrt %36 : vector<128x1xf32>
    %cst_16 = arith.constant 0.000000e+00 : f32
    %38 = vector.broadcast %cst_16 : f32 to vector<128x1xf32>
    %39 = arith.select %34, %37, %38 : vector<128x1xi1>, vector<128x1xf32>
    %cst_17 = arith.constant dense<true> : vector<128x128xi1>
    %40 = arith.xori %15, %cst_17 : vector<128x128xi1>
    %41 = vector.broadcast %22 : vector<1x128xi1> to vector<128x128xi1>
    %42 = arith.andi %40, %41 : vector<128x128xi1>
    %cst_18 = arith.constant 0x7F800000 : f32
    %43 = vector.broadcast %cst_18 : f32 to vector<128x128xf32>
    %44 = arith.select %42, %10, %43 : vector<128x128xi1>, vector<128x128xf32>
    %cst_19 = arith.constant dense<0x7F800000> : vector<128xf32>
    %45 = vector.multi_reduction <minimumf>, %44, %cst_19 [1] : vector<128x128xf32> to vector<128xf32>
    %46 = vector.shape_cast %45 : vector<128xf32> to vector<128x1xf32>
    %cst_20 = arith.constant 9.99999996E-13 : f32
    %47 = vector.broadcast %cst_20 : f32 to vector<128x1xf32>
    %48 = arith.maximumf %46, %47 : vector<128x1xf32>
    %49 = math.sqrt %48 : vector<128x1xf32>
    %50 = arith.subf %39, %49 : vector<128x1xf32>
    %cst_21 = arith.constant 3.000000e-01 : f32
    %51 = vector.broadcast %cst_21 : f32 to vector<128x1xf32>
    %52 = arith.addf %50, %51 : vector<128x1xf32>
    %cst_22 = arith.constant 0.000000e+00 : f32
    %53 = vector.broadcast %cst_22 : f32 to vector<128x1xf32>
    %54 = arith.maximumf %52, %53 : vector<128x1xf32>
    %c8_i32_23 = arith.constant 8 : i32
    %55 = vector.broadcast %c8_i32_23 : i32 to vector<128x1xi32>
    %56 = arith.cmpi slt, %19, %55 : vector<128x1xi32>
    %cst_24 = arith.constant 0.000000e+00 : f32
    %57 = vector.broadcast %cst_24 : f32 to vector<128x1xf32>
    %58 = arith.select %56, %54, %57 : vector<128x1xi1>, vector<128x1xf32>
    %59 = vector.shape_cast %58 : vector<128x1xf32> to vector<1x128x1xf32>
    %cst_25 = arith.constant dense<0.000000e+00> : vector<1xf32>
    %60 = vector.multi_reduction <add>, %59, %cst_25 [1, 2] : vector<1x128x1xf32> to vector<1xf32>
    %61 = vector.shape_cast %60 : vector<1xf32> to vector<1x1x1xf32>
    %62 = vector.extract %61[0, 0, 0] : f32 from vector<1x1x1xf32>
    %63 = vector.broadcast %62 : f32 to vector<1x1x1xf32>
    %c0_26 = arith.constant 0 : index
    %c0_27 = arith.constant 0 : index
    %c0_28 = arith.constant 0 : index
    %64 = vector.load %arg7[%c0_26, %c0_27, %c0_28] : memref<1x1x1xf32, #tpu.memory_space<vmem>>, vector<1x1x1xf32>
    tpu.vector_store %arg7[%c0_26, %c0_27, %c0_28], %63 {strides = array<i32>} : memref<1x1x1xf32, #tpu.memory_space<vmem>>, vector<1x1x1xf32>,
    return
  }
  func.func @transform_0(%arg0: i32) -> (i32, i32) {
    %c0_i32 = arith.constant 0 : i32
    %c0_i32_0 = arith.constant 0 : i32
    return %arg0, %c0_i32 : i32, i32
  }
  func.func @transform_1(%arg0: i32) -> (i32, i32) {
    %c0_i32 = arith.constant 0 : i32
    %c0_i32_0 = arith.constant 0 : i32
    %c0_i32_1 = arith.constant 0 : i32
    return %c0_i32, %c0_i32_0 : i32, i32
  }
  func.func @transform_2(%arg0: i32) -> (i32, i32) {
    %c0_i32 = arith.constant 0 : i32
    %c0_i32_0 = arith.constant 0 : i32
    return %arg0, %c0_i32 : i32, i32
  }
  func.func @transform_3(%arg0: i32) -> (i32, i32) {
    %c0_i32 = arith.constant 0 : i32
    %c0_i32_0 = arith.constant 0 : i32
    %c0_i32_1 = arith.constant 0 : i32
    return %c0_i32, %c0_i32_0 : i32, i32
  }
  func.func @transform_4(%arg0: i32) -> (i32, i32) {
    %c0_i32 = arith.constant 0 : i32
    %c0_i32_0 = arith.constant 0 : i32
    return %arg0, %c0_i32 : i32, i32
  }
  func.func @transform_5(%arg0: i32) -> (i32, i32) {
    %c0_i32 = arith.constant 0 : i32
    %c0_i32_0 = arith.constant 0 : i32
    %c0_i32_1 = arith.constant 0 : i32
    return %c0_i32, %c0_i32_0 : i32, i32
  }
  func.func @transform_6(%arg0: i32) -> (i32, i32, i32) {
    %c0_i32 = arith.constant 0 : i32
    %c0_i32_0 = arith.constant 0 : i32
    %c0_i32_1 = arith.constant 0 : i32
    return %arg0, %c0_i32, %c0_i32_0 : i32, i32, i32
  }
}

</mosaic_0001>

<bundles_post_ra>
// kernel: tpu_custom_call.1
= control target key start
LH: loop header
LB: loop body
LE: loop exit
PB: predicated region body
PF: predicated region fallthrough
CT: control target
= control target key end

     0   :  { %s3493_s0 = inlined_call_operand.vmem [shape: f32[128,128], index: 0, kind: input, shape index: {}]   ;;  %s3494_s1 = inlined_call_operand.vmem [shape: f32[128,128], index: 1, kind: input, shape index: {}]   ;;  %s3495_s2 = inlined_call_operand.vmem [shape: f32[128,1], index: 2, kind: input, shape index: {}]   ;;  %s3496_s3 = inlined_call_operand.vmem [shape: f32[1,128], index: 3, kind: input, shape index: {}]   ;;  %s3497_s4 = inlined_call_operand.vmem [shape: s32[128,1], index: 4, kind: input, shape index: {}]   ;;  %s3498_s5 = inlined_call_operand.vmem [shape: s32[1,128], index: 5, kind: input, shape index: {}]   ;;  %s3499_s6 = inlined_call_operand.hbm [shape: f32[1,1,1], index: 6, kind: output, shape index: {}]  }
   0x1   :  { %v55_v0 = vld [vmem:[%s3494_s1 + $0x78] sm:$0xff]  ;;  %v54_v1 = vld [vmem:[%s3494_s1 + $0x70] sm:$0xff]  ;;  %v53_v2 = vld [vmem:[%s3494_s1 + $0x68] sm:$0xff] }
   0x2   :  { %v2829_v3 = vand.u32 4294901760, %v55_v0  ;;  %v2831_v4 = vand.u32 4294901760, %v54_v1  ;;  %v2833_v5 = vand.u32 4294901760, %v53_v2  ;;  %v52_v6 = vld [vmem:[%s3494_s1 + $0x60] sm:$0xff]  ;;  %v51_v7 = vld [vmem:[%s3494_s1 + $0x58] sm:$0xff]  ;;  %v50_v16 = vld [vmem:[%s3494_s1 + $0x50] sm:$0xff] }
   0x3   :  { %v2841_v8 = vand.u32 4294901760, %v52_v6  ;;  %v2854_v12 = vand.u32 4294901760, %v51_v7  ;;  %v2877_v20 = vand.u32 4294901760, %v50_v16  ;;  %v49_v26 = vld [vmem:[%s3494_s1 + $0x48] sm:$0xff] }
   0x4   :  { %2414 = vmatprep.subr.mxu0 %v2829_v3  ;;  %v2845_v9 = vsub.f32 %v55_v0, %v2829_v3  ;;  %v2848_v10 = vsub.f32 %v54_v1, %v2831_v4  ;;  %v2851_v11 = vsub.f32 %v53_v2, %v2833_v5 }
   0x5   :  { %2415 = vmatpush3.xpose.msra.mxu0 %v2829_v3  ;;  %v2870_v17 = vsub.f32 %v52_v6, %v2841_v8  ;;  %v2880_v21 = vsub.f32 %v51_v7, %v2854_v12 }
   0x6   :  { %2416 = vmatprep.subr.mxu0 %v2831_v4  ;;  %v2858_v13 = vand.u32 4294901760, %v2845_v9  ;;  %v2861_v14 = vand.u32 4294901760, %v2848_v10  ;;  %v2864_v15 = vand.u32 4294901760, %v2851_v11 }
   0x7   :  { %v2886_v25 = vand.u32 4294901760, %v2870_v17 }
   0x8   :  { %3554 = vst [vmem:[#allocation5_spill] sm:$0xff] %v2858_v13  ;;  %3555 = vst [vmem:[#allocation6_spill] sm:$0xff] %v2861_v14  ;;  %v301_v18 = vsub.f32 %v2845_v9, %v2858_v13  ;;  %v308_v19 = vsub.f32 %v2848_v10, %v2861_v14  ;;  %v315_v24 = vsub.f32 %v2851_v11, %v2864_v15 }
   0x9   :  { %3556 = vst [vmem:[#allocation7_spill] sm:$0xff] %v2864_v15  ;;  %2417 = vmatpush3.xpose.msra.mxu0 %v2831_v4  ;;  %3557 = vst [vmem:[#allocation8_spill] sm:$0xff] %v2886_v25 }
   0xa   :  { %2418 = vmatprep.subr.mxu0 %v2833_v5  ;;  %v302_v22 = vand.u32 4294901760, %v301_v18  ;;  %v309_v23 = vand.u32 4294901760, %v308_v19 }
   0xc   :  { %2470 = vmatprep.subr.mxu1 %v302_v22 }
   0xd   :  { %11 = vsyncpa [#allocation3], 0  ;;  %2419 = vmatpush3.xpose.msra.mxu0 %v2833_v5  ;;  %2471 = vmatpush3.xpose.msra.mxu1 %v302_v22  ;;  %v2892_v27 = vand.u32 4294901760, %v49_v26  ;;  %v316_v28 = vand.u32 4294901760, %v315_v24  ;;  %v322_v29 = vsub.f32 %v2870_v17, %v2886_v25  ;;  %v2898_v30 = vand.u32 4294901760, %v2880_v21  ;;  %v48_v31 = vld [vmem:[%s3494_s1 + $0x40] sm:$0xff] }
   0xe   :  { %2420 = vmatprep.subr.mxu0 %v2841_v8  ;;  %2472 = vmatprep.subr.mxu1 %v309_v23  ;;  %v2904_v32 = vsub.f32 %v50_v16, %v2877_v20  ;;  %v24_v33 = vld [vmem:[%s3493_s0] sm:$0xff]  ;;  %v2910_v34 = vand.u32 4294901760, %v48_v31  ;;  %v47_v39 = vld [vmem:[%s3494_s1 + $0x38] sm:$0xff]  ;;  %v46_v47 = vld [vmem:[%s3494_s1 + $0x30] sm:$0xff]  ;;  %vm2783_vm5 = vmmov 1   ;;  %vm2162_vm13 = vcmask 7168  }
   0xf   :  { %3558 = vst [vmem:[#allocation9_spill] sm:$0xff] %v2898_v30  ;;  %v2912_v35 = vand.u32 4294901760, %v24_v33  ;;  %v323_v36 = vand.u32 4294901760, %v322_v29  ;;  %v329_v37 = vsub.f32 %v2880_v21, %v2898_v30  ;;  %v2924_v40 = vsub.f32 %v49_v26, %v2892_v27  ;;  %v45_v55 = vld [vmem:[%s3494_s1 + $0x28] sm:$0xff]  ;;  %v44_v61 = vld [vmem:[%s3494_s1 + $0x20] sm:$0xff]  ;;  %v43_v6 = vld [vmem:[%s3494_s1 + $0x18] sm:$0xff] }
  0x10   :  { %v2918_v38 = vand.u32 4294901760, %v2904_v32  ;;  %v2931_v42 = vand.u32 4294901760, %v47_v39  ;;  %v2944_v48 = vsub.f32 %v48_v31, %v2910_v34  ;;  %v2950_v50 = vand.u32 4294901760, %v46_v47 }
  0x11   :  { %2421 = vmatpush3.xpose.msra.mxu0 %v2841_v8  ;;  %2473 = vmatpush3.xpose.msra.mxu1 %v309_v23  ;;  %3559 = vst [vmem:[#allocation10_spill] sm:$0xff] %v2912_v35  ;;  %v2927_v41 = vsub.f32 %v24_v33, %v2912_v35  ;;  %v330_v44 = vand.u32 4294901760, %v329_v37  ;;  %v2938_v46 = vand.u32 4294901760, %v2924_v40  ;;  %v2965_v57 = vand.u32 4294901760, %v45_v55  ;;  %v42_v23 = vld [vmem:[%s3494_s1 + $0x10] sm:$0xff]  ;;  %v41_v33 = vld [vmem:[%s3494_s1 + $0x8] sm:$0xff] }
  0x12   :  { %2422 = vmatprep.subr.mxu0 %v2854_v12  ;;  %2474 = vmatprep.subr.mxu1 %v316_v28  ;;  %3560 = vst [vmem:[#allocation11_spill] sm:$0xff] %v2918_v38  ;;  %v336_v45 = vsub.f32 %v2904_v32, %v2918_v38  ;;  %v2956_v54 = vand.u32 4294901760, %v2944_v48  ;;  %v2962_v56 = vsub.f32 %v47_v39, %v2931_v42  ;;  %v2980_v63 = vand.u32 4294901760, %v44_v61  ;;  %v25_v39 = vld [vmem:[%s3493_s0 + $0x8] sm:$0xff] }
  0x13   :  { %2502 = vmatprep.mubr.f32.mxu1 %v2912_v35  ;;  %v3500_v43 = vand.u32 4294901760, %v2927_v41  ;;  %3561 = vst [vmem:[#allocation12_spill] sm:$0xff] %v2938_v46  ;;  %v343_v53 = vsub.f32 %v2924_v40, %v2938_v46  ;;  %v2977_v62 = vsub.f32 %v46_v47, %v2950_v50  ;;  %v2992_v7 = vsub.f32 %v45_v55, %v2965_v57  ;;  %v32_v46 = vld [vmem:[%s3493_s0 + $0x40] sm:$0xff] }
  0x14   :  { %v337_v52 = vand.u32 4294901760, %v336_v45  ;;  %3562 = vst [vmem:[#allocation13_spill] sm:$0xff] %v2956_v54  ;;  %v350_v59 = vsub.f32 %v2944_v48, %v2956_v54  ;;  %v2971_v60 = vand.u32 4294901760, %v2962_v56  ;;  %v2995_v16 = vand.u32 4294901760, %v43_v6 }
  0x15   :  { %2423 = vmatpush3.xpose.msra.mxu0 %v2854_v12  ;;  %2475 = vmatpush3.xpose.msra.mxu1 %v316_v28  ;;  %v140_v49 = vsub.f32 %v2927_v41, %v3500_v43  ;;  %v344_v58 = vand.u32 4294901760, %v343_v53  ;;  %v2986_v2 = vand.u32 4294901760, %v2977_v62  ;;  %v3001_v22 = vand.u32 4294901760, %v2992_v7  ;;  %v26_v53 = vld [vmem:[%s3493_s0 + $0x10] sm:$0xff] }
  0x16   :  { %2424 = vmatprep.subr.mxu0 %v2877_v20  ;;  %2476 = vmatprep.subr.mxu1 %v323_v36  ;;  %3563 = vst [vmem:[#allocation14_spill] sm:$0xff] %v2971_v60  ;;  %v351_v0 = vand.u32 4294901760, %v350_v59  ;;  %v357_v1 = vsub.f32 %v2962_v56, %v2971_v60  ;;  %v3007_v24 = vsub.f32 %v44_v61, %v2980_v63  ;;  %v3010_v26 = vand.u32 4294901760, %v42_v23 }
  0x17   :  { %v141_v51 = vand.u32 4294901760, %v140_v49  ;;  %3564 = vst [vmem:[#allocation15_spill] sm:$0xff] %v2986_v2  ;;  %v364_v19 = vsub.f32 %v2977_v62, %v2986_v2  ;;  %3565 = vst [vmem:[#allocation16_spill] sm:$0xff] %v3001_v22  ;;  %v371_v29 = vsub.f32 %v2992_v7, %v3001_v22  ;;  %v3025_v37 = vand.u32 4294901760, %v41_v33 }
  0x18   :  { %v358_v18 = vand.u32 4294901760, %v357_v1  ;;  %3566 = vst [vmem:[#allocation17_spill] sm:$0xff] %v3010_v26  ;;  %v3016_v31 = vand.u32 4294901760, %v3007_v24  ;;  %v3037_v49 = vsub.f32 %v42_v23, %v3010_v26  ;;  %v28_v23 = vld [vmem:[%s3493_s0 + $0x20] sm:$0xff]  ;;  %v3144_v25 = vand.u32 4294901760, %v32_v46 }
  0x19   :  { %2425 = vmatpush3.xpose.msra.mxu0 %v2877_v20  ;;  %2477 = vmatpush3.xpose.msra.mxu1 %v323_v36  ;;  %v365_v28 = vand.u32 4294901760, %v364_v19  ;;  %v3022_v36 = vsub.f32 %v43_v6, %v2995_v16  ;;  %3568 = vst [vmem:[#allocation19_spill] sm:$0xff] %v3025_v37  ;;  %v3049_v55 = vsub.f32 %v41_v33, %v3025_v37  ;;  %v3062_v6 = vand.u32 4294901760, %v26_v53 }
  0x1a   :  { %2426 = vmatprep.subr.mxu0 %v2892_v27  ;;  %2478 = vmatprep.subr.mxu1 %v330_v44  ;;  %3567 = vst [vmem:[#allocation18_spill] sm:$0xff] %v3016_v31  ;;  %v378_v45 = vsub.f32 %v3007_v24, %v3016_v31  ;;  %v3060_v1 = vand.u32 4294901760, %v3037_v49  ;;  %v31_v31 = vld [vmem:[%s3493_s0 + $0x38] sm:$0xff]  ;;  %vm2204_vm14 = vcmask 0  }
  0x1b   :  { %2446 = vmatprep.mubr.f32.mxu0 %v141_v51  ;;  %v3034_v47 = vand.u32 4294901760, %v3022_v36  ;;  %v40_v51 = vld [vmem:[%s3494_s1] sm:$0xff]  ;;  %v3086_v43 = vsub.f32 %v26_v53, %v3062_v6 }
  0x1c   :  { %v379_v59 = vand.u32 4294901760, %v378_v45  ;;  %3571 = vst [vmem:[#allocation22_spill] sm:$0xff] %v3060_v1 }
  0x1d   :  { %2427 = vmatpush3.xpose.msra.mxu0 %v2892_v27  ;;  %2479 = vmatpush3.xpose.msra.mxu1 %v330_v44  ;;  %v372_v44 = vand.u32 4294901760, %v371_v29  ;;  %3569 = vst [vmem:[#allocation20_spill] sm:$0xff] %v3034_v47  ;;  %v385_v61 = vsub.f32 %v3022_v36, %v3034_v47  ;;  %v29_v29 = vld [vmem:[%s3493_s0 + $0x28] sm:$0xff]  ;;  %3574 = vst [vmem:[#allocation25_spill] sm:$0xff] %v3086_v43  ;;  %v30_v47 = vld [vmem:[%s3493_s0 + $0x30] sm:$0xff]  ;;  %v3580_v38 = vand.u32 4294901760, %v3086_v43 }
  0x1e   :  { %2428 = vmatprep.subr.mxu0 %v2910_v34  ;;  %2480 = vmatprep.subr.mxu1 %v337_v52  ;;  %v3109_v35 = vand.u32 4294901760, %v30_v47 }
  0x1f   :  { %v386_v33 = vand.u32 4294901760, %v385_v61  ;;  %v3111_v61 = vand.u32 4294901760, %v31_v31 }
  0x21   :  { %2429 = vmatpush3.xpose.msra.mxu0 %v2910_v34  ;;  %2481 = vmatpush3.xpose.msra.mxu1 %v337_v52  ;;  %v3042_v52 = vand.u32 4294901760, %v25_v39 }
  0x22   :  { %2430 = vmatprep.subr.mxu0 %v2931_v42  ;;  %2482 = vmatprep.subr.mxu1 %v344_v58 }
  0x25   :  { %2431 = vmatpush3.xpose.msra.mxu0 %v2931_v42  ;;  %2483 = vmatpush3.xpose.msra.mxu1 %v344_v58  ;;  %v27_v58 = vld [vmem:[%s3493_s0 + $0x18] sm:$0xff] }
  0x26   :  { %2432 = vmatprep.subr.mxu0 %v2950_v50  ;;  %2484 = vmatprep.subr.mxu1 %v351_v0  ;;  %v3067_v19 = vand.u32 4294901760, %v27_v58 }
  0x29   :  { %2433 = vmatpush3.xpose.msra.mxu0 %v2950_v50  ;;  %2485 = vmatpush3.xpose.msra.mxu1 %v351_v0  ;;  %v3057_v0 = vand.u32 4294901760, %v40_v51 }
  0x2a   :  { %2434 = vmatprep.subr.mxu0 %v2965_v57  ;;  %2486 = vmatprep.subr.mxu1 %v358_v18 }
  0x2b   :  { %3570 = vst [vmem:[#allocation21_spill] sm:$0xff] %v3057_v0  ;;  %v3083_v45 = vsub.f32 %v40_v51, %v3057_v0  ;;  %v3100_v51 = vand.u32 4294901760, %v29_v29 }
  0x2d   :  { %2435 = vmatpush3.xpose.msra.mxu0 %v2965_v57  ;;  %2487 = vmatpush3.xpose.msra.mxu1 %v358_v18  ;;  %v3065_v18 = vsub.f32 %v25_v39, %v3042_v52  ;;  %v392_v39 = vsub.f32 %v3037_v49, %v3060_v1  ;;  %v3098_v1 = vsub.f32 %v27_v58, %v3067_v19  ;;  %v3107_v2 = vand.u32 4294901760, %v3083_v45 }
  0x2e   :  { %2436 = vmatprep.subr.mxu0 %v2980_v63  ;;  %2488 = vmatprep.subr.mxu1 %v365_v28  ;;  %v3138_v58 = vsub.f32 %v31_v31, %v3111_v61  ;;  %v34_v31 = vld [vmem:[%s3493_s0 + $0x50] sm:$0xff] }
  0x2f   :  { %3572 = vst [vmem:[#allocation23_spill] sm:$0xff] %v3065_v18  ;;  %3575 = vst [vmem:[#allocation26_spill] sm:$0xff] %v3098_v1  ;;  %v393_v22 = vand.u32 4294901760, %v392_v39  ;;  %v3122_v39 = vsub.f32 %v29_v29, %v3100_v51  ;;  %v406_v54 = vsub.f32 %v3083_v45, %v3107_v2  ;;  %v3135_v29 = vsub.f32 %v30_v47, %v3109_v35 }
  0x30   :  { %3576 = vst [vmem:[#allocation27_spill] sm:$0xff] %v3107_v2 }
  0x31   :  { %2437 = vmatpush3.xpose.msra.mxu0 %v2980_v63  ;;  %2489 = vmatpush3.xpose.msra.mxu1 %v365_v28  ;;  %v3074_v28 = vand.u32 4294901760, %v3049_v55  ;;  %3579 = vst [vmem:[#allocation29_spill] sm:$0xff] %v3122_v39  ;;  %v3583_v13 = vand.u32 4294901760, %v3122_v39 }
  0x32   :  { %2438 = vmatprep.subr.mxu0 %v2995_v16  ;;  %2490 = vmatprep.subr.mxu1 %v372_v44 }
  0x33   :  { %3573 = vst [vmem:[#allocation24_spill] sm:$0xff] %v3074_v28  ;;  %v399_v53 = vsub.f32 %v3049_v55, %v3074_v28 }
  0x35   :  { %2439 = vmatpush3.xpose.msra.mxu0 %v2995_v16  ;;  %2491 = vmatpush3.xpose.msra.mxu1 %v372_v44  ;;  %v3088_v44 = vand.u32 4294901760, %v28_v23 }
  0x36   :  { %2440 = vmatprep.subr.mxu0 %v3010_v26  ;;  %2492 = vmatprep.subr.mxu1 %v379_v59 }
  0x37   :  { %v3115_v60 = vsub.f32 %v28_v23, %v3088_v44  ;;  %v33_v23 = vld [vmem:[%s3493_s0 + $0x48] sm:$0xff] }
  0x38   :  { %v3150_v47 = vand.u32 4294901760, %v33_v23 }
  0x39   :  { %2441 = vmatpush3.xpose.msra.mxu0 %v3010_v26  ;;  %2493 = vmatpush3.xpose.msra.mxu1 %v379_v59  ;;  %3577 = vst [vmem:[#allocation28_spill] sm:$0xff] %v3115_v60  ;;  %v3578_v59 = vand.u32 4294901760, %v3065_v18 }
  0x3a   :  { %2442 = vmatprep.subr.mxu0 %v3025_v37  ;;  %2494 = vmatprep.subr.mxu1 %v386_v33 }
  0x3b   :  { %v150_v28 = vsub.f32 %v3065_v18, %v3578_v59  ;;  %v400_v59 = vand.u32 4294901760, %v399_v53  ;;  %v3581_v53 = vand.u32 4294901760, %v3098_v1 }
  0x3d   :  { %2443 = vmatpush3.xpose.msra.mxu0 %v3025_v37  ;;  %2495 = vmatpush3.xpose.msra.mxu1 %v386_v33  ;;  %v160_v33 = vsub.f32 %v3086_v43, %v3580_v38  ;;  %v151_v15 = vand.u32 4294901760, %v150_v28  ;;  %v170_v14 = vsub.f32 %v3098_v1, %v3581_v53  ;;  %v35_v38 = vld [vmem:[%s3493_s0 + $0x58] sm:$0xff]  ;;  %v407_v28 = vand.u32 4294901760, %v406_v54 }
  0x3e   :  { %2444 = vmatprep.subr.mxu0 %v3057_v0  ;;  %2496 = vmatprep.subr.mxu1 %v393_v22  ;;  %v3582_v1 = vand.u32 4294901760, %v3115_v60  ;;  %v190_v54 = vsub.f32 %v3122_v39, %v3583_v13  ;;  %v3174_v53 = vsub.f32 %v33_v23, %v3150_v47  ;;  %v3176_v2 = vand.u32 4294901760, %v35_v38 }
  0x3f   :  { %v161_v30 = vand.u32 4294901760, %v160_v33  ;;  %v171_v18 = vand.u32 4294901760, %v170_v14  ;;  %v37_v14 = vld [vmem:[%s3493_s0 + $0x68] sm:$0xff]  ;;  %v3584_v13 = vand.u32 4294901760, %v3135_v29 }
  0x40   :  { %v180_v43 = vsub.f32 %v3115_v60, %v3582_v1  ;;  %v36_v1 = vld [vmem:[%s3493_s0 + $0x60] sm:$0xff]  ;;  %v191_v60 = vand.u32 4294901760, %v190_v54  ;;  %v3551_v37 = vand.u32 4294901760, %v3174_v53  ;;  %v3200_v26 = vsub.f32 %v35_v38, %v3176_v2 }
  0x41   :  { %2445 = vmatpush3.xpose.msra.mxu0 %v3057_v0  ;;  %2497 = vmatpush3.xpose.msra.mxu1 %v393_v22  ;;  %v3166_v0 = vsub.f32 %v32_v46, %v3144_v25  ;;  %v3168_v22 = vand.u32 4294901760, %v34_v31  ;;  %v3585_v46 = vand.u32 4294901760, %v3138_v58  ;;  %v3196_v39 = vand.u32 4294901760, %v36_v1 }
  0x42   :  { %2498 = vmatprep.subr.mxu1 %v400_v59  ;;  %2526 = vmatprep.subr.mxu0 %v2845_v9  ;;  %v181_v33 = vand.u32 4294901760, %v180_v43  ;;  %v39_v43 = vld [vmem:[%s3493_s0 + $0x78] sm:$0xff] }
  0x43   :  { %v210_v23 = vsub.f32 %v3138_v58, %v3585_v46  ;;  %v3553_v46 = vand.u32 4294901760, %v3200_v26 }
  0x44   :  { %2447 = vmatmul.mubr.f32.vlgmr.msra.gmra.mxu0 %v151_v15  ;;  %v200_v15 = vsub.f32 %v3135_v29, %v3584_v13  ;;  %v3202_v13 = vand.u32 4294901760, %v37_v14 }
  0x45   :  { %2499 = vmatpush3.xpose.msra.mxu1 %v400_v59  ;;  %2527 = vmatpush3.xpose.msra.mxu0 %v2845_v9  ;;  %v3552_v59 = vand.u32 4294901760, %v3166_v0  ;;  %v3194_v9 = vsub.f32 %v34_v31, %v3168_v22  ;;  %v211_v31 = vand.u32 4294901760, %v210_v23 }
  0x46   :  { %2500 = vmatprep.subr.mxu1 %v407_v28  ;;  %2528 = vmatprep.subr.mxu0 %v2848_v10  ;;  %v3228_v23 = vsub.f32 %v37_v14, %v3202_v13 }
  0x47   :  { %2449 = vmatprep.mubr.f32.mxu0 %v161_v30  ;;  %v38_v30 = vld [vmem:[%s3493_s0 + $0x70] sm:$0xff]  ;;  %v220_v38 = vsub.f32 %v3166_v0, %v3552_v59  ;;  %v239_v54 = vand.u32 4294901760, %v3194_v9  ;;  %v250_v59 = vsub.f32 %v3200_v26, %v3553_v46 }
  0x48   :  { %2450 = vmatmul.mubr.f32.gmra.mxu0 %v171_v18  ;;  %v201_v18 = vand.u32 4294901760, %v200_v15  ;;  %v230_v15 = vsub.f32 %v3174_v53, %v3551_v37 }
  0x49   :  { %2501 = vmatpush3.xpose.msra.mxu1 %v407_v28  ;;  %2529 = vmatpush3.xpose.msra.mxu0 %v2848_v10  ;;  %v3218_v28 = vsub.f32 %v36_v1, %v3196_v39  ;;  %v3220_v10 = vand.u32 4294901760, %v38_v30  ;;  %v240_v1 = vsub.f32 %v3194_v9, %v239_v54 }
  0x4a   :  { %2530 = vmatprep.subr.mxu0 %v2851_v11  ;;  %2582 = vmatprep.subr.mxu1 %v2829_v3 }
  0x4b   :  { %2452 = vmatprep.mubr.f32.mxu0 %v181_v33  ;;  %v3230_v33 = vand.u32 4294901760, %v39_v43  ;;  %v259_v14 = vand.u32 4294901760, %v3218_v28  ;;  %v3242_v37 = vsub.f32 %v38_v30, %v3220_v10  ;;  %v241_v30 = vand.u32 4294901760, %v240_v1 }
  0x4c   :  { %2503 = vmatmul.mubr.f32.vlgmr.msra.gmra.mxu1 %v3042_v52  ;;  %2453 = vmatmul.mubr.f32.gmra.mxu0 %v191_v60  ;;  %v221_v60 = vand.u32 4294901760, %v220_v38 }
  0x4d   :  { %2531 = vmatpush3.xpose.msra.mxu0 %v2851_v11  ;;  %2583 = vmatpush3.xpose.msra.mxu1 %v2829_v3  ;;  %v231_v11 = vand.u32 4294901760, %v230_v15  ;;  %v3250_v38 = vsub.f32 %v39_v43, %v3230_v33  ;;  %v279_v15 = vand.u32 4294901760, %v3242_v37 }
  0x4e   :  { %2532 = vmatprep.subr.mxu0 %v2870_v17  ;;  %2584 = vmatprep.subr.mxu1 %v2831_v4 }
  0x4f   :  { %2505 = vmatprep.mubr.f32.mxu1 %v3062_v6  ;;  %2455 = vmatprep.mubr.f32.mxu0 %v201_v18  ;;  %v269_v18 = vand.u32 4294901760, %v3228_v23  ;;  %v289_v46 = vand.u32 4294901760, %v3250_v38 }
  0x50   :  { %2506 = vmatmul.mubr.f32.gmra.mxu1 %v3067_v19  ;;  %2456 = vmatmul.mubr.f32.gmra.mxu0 %v211_v31  ;;  %v260_v31 = vsub.f32 %v3218_v28, %v259_v14 }
  0x51   :  { %2533 = vmatpush3.xpose.msra.mxu0 %v2870_v17  ;;  %2585 = vmatpush3.xpose.msra.mxu1 %v2831_v4  ;;  %v251_v17 = vand.u32 4294901760, %v250_v59  ;;  %v270_v43 = vsub.f32 %v3228_v23, %v269_v18  ;;  %v280_v59 = vsub.f32 %v3242_v37, %v279_v15 }
  0x52   :  { %2534 = vmatprep.subr.mxu0 %v2880_v21  ;;  %2586 = vmatprep.subr.mxu1 %v2833_v5 }
  0x53   :  { %2508 = vmatprep.mubr.f32.mxu1 %v3088_v44  ;;  %2458 = vmatprep.mubr.f32.mxu0 %v221_v60  ;;  %v261_v60 = vand.u32 4294901760, %v260_v31  ;;  %v271_v1 = vand.u32 4294901760, %v270_v43  ;;  %v3598_v31 = vld [vmem:[#allocation29_spill] sm:$0xff] }
  0x54   :  { %2509 = vmatmul.mubr.f32.gmra.mxu1 %v3100_v51  ;;  %2459 = vmatmul.mubr.f32.gmra.mxu0 %v231_v11  ;;  %v281_v11 = vand.u32 4294901760, %v280_v59  ;;  %v3602_v59 = vld [vmem:[#allocation9_spill] sm:$0xff] }
  0x55   :  { %2535 = vmatpush3.xpose.msra.mxu0 %v2880_v21  ;;  %2587 = vmatpush3.xpose.msra.mxu1 %v2833_v5  ;;  %v290_v21 = vsub.f32 %v3250_v38, %v289_v46 }
  0x56   :  { %2536 = vmatprep.subr.mxu0 %v2904_v32  ;;  %2588 = vmatprep.subr.mxu1 %v2841_v8 }
  0x57   :  { %2511 = vmatprep.mubr.f32.mxu1 %v3109_v35  ;;  %2461 = vmatprep.mubr.f32.mxu0 %v241_v30  ;;  %v291_v30 = vand.u32 4294901760, %v290_v21  ;;  %v3605_v21 = vld [vmem:[#allocation11_spill] sm:$0xff] }
  0x58   :  { %2512 = vmatmul.mubr.f32.gmra.mxu1 %v3111_v61  ;;  %2462 = vmatmul.mubr.f32.gmra.mxu0 %v251_v17  ;;  %v3599_v17 = vld [vmem:[#allocation8_spill] sm:$0xff] }
  0x59   :  { %2537 = vmatpush3.xpose.msra.mxu0 %v2904_v32  ;;  %2589 = vmatpush3.xpose.msra.mxu1 %v2841_v8  ;;  %v3586_v32 = vand.u32 4294901760, %v2927_v41 }
  0x5a   :  { %2538 = vmatprep.subr.mxu0 %v2924_v40  ;;  %2590 = vmatprep.subr.mxu1 %v2854_v12 }
  0x5b   :  { %2514 = vmatprep.mubr.f32.mxu1 %v3144_v25  ;;  %2464 = vmatprep.mubr.f32.mxu0 %v261_v60 }
  0x5c   :  { %2515 = vmatmul.mubr.f32.gmra.mxu1 %v3150_v47  ;;  %2465 = vmatmul.mubr.f32.gmra.mxu0 %v271_v1  ;;  %v3604_v1 = vand.u32 4294901760, %v3598_v31 }
  0x5d   :  { %2539 = vmatpush3.xpose.msra.mxu0 %v2924_v40  ;;  %2591 = vmatpush3.xpose.msra.mxu1 %v2854_v12  ;;  %v3587_v40 = vld [vmem:[#allocation17_spill] sm:$0xff] }
  0x5e   :  { %2540 = vmatprep.subr.mxu0 %v2944_v48  ;;  %2592 = vmatprep.subr.mxu1 %v2877_v20 }
  0x5f   :  { %2517 = vmatprep.mubr.f32.mxu1 %v3168_v22  ;;  %2467 = vmatprep.mubr.f32.mxu0 %v281_v11  ;;  %v3607_v11 = vand.u32 4294901760, %v3138_v58 }
  0x60   :  { %2518 = vmatmul.mubr.f32.gmra.mxu1 %v3176_v2  ;;  %2468 = vmatmul.mubr.f32.gmra.mxu0 %v291_v30  ;;  %v3608_v30 = vld [vmem:[#allocation12_spill] sm:$0xff] }
  0x61   :  { %2541 = vmatpush3.xpose.msra.mxu0 %v2944_v48  ;;  %2593 = vmatpush3.xpose.msra.mxu1 %v2877_v20  ;;  %v3589_v48 = vld [vmem:[#allocation5_spill] sm:$0xff] }
  0x62   :  { %2542 = vmatprep.subr.mxu0 %v2962_v56  ;;  %2594 = vmatprep.subr.mxu1 %v2892_v27 }
  0x63   :  { %2520 = vmatprep.mubr.f32.mxu1 %v3196_v39  ;;  %2558 = vmatprep.mubr.f32.mxu0 %v2927_v41  ;;  %v3588_v41 = vld [vmem:[#allocation19_spill] sm:$0xff] }
  0x64   :  { %2521 = vmatmul.mubr.f32.gmra.mxu1 %v3202_v13 }
  0x65   :  { %2543 = vmatpush3.xpose.msra.mxu0 %v2962_v56  ;;  %2595 = vmatpush3.xpose.msra.mxu1 %v2892_v27  ;;  %v3590_v56 = vld [vmem:[#allocation23_spill] sm:$0xff] }
  0x66   :  { %2544 = vmatprep.subr.mxu0 %v2977_v62  ;;  %2596 = vmatprep.subr.mxu1 %v2910_v34 }
  0x67   :  { %2523 = vmatprep.mubr.f32.mxu1 %v3220_v10 }
  0x68   :  { %2524 = vmatmul.mubr.f32.gmra.mxu1 %v3230_v33 }
  0x69   :  { %2545 = vmatpush3.xpose.msra.mxu0 %v2977_v62  ;;  %2597 = vmatpush3.xpose.msra.mxu1 %v2910_v34  ;;  %v3591_v62 = vld [vmem:[#allocation21_spill] sm:$0xff] }
  0x6a   :  { %2546 = vmatprep.subr.mxu0 %v2992_v7  ;;  %2598 = vmatprep.subr.mxu1 %v2931_v42 }
  0x6b   :  { %2614 = vmatprep.mubr.f32.mxu1 %v3586_v32 }
  0x6d   :  { %2547 = vmatpush3.xpose.msra.mxu0 %v2992_v7  ;;  %2599 = vmatpush3.xpose.msra.mxu1 %v2931_v42  ;;  %v3592_v7 = vld [vmem:[#allocation6_spill] sm:$0xff] }
  0x6e   :  { %2548 = vmatprep.subr.mxu0 %v3007_v24  ;;  %2600 = vmatprep.subr.mxu1 %v2950_v50 }
  0x71   :  { %2549 = vmatpush3.xpose.msra.mxu0 %v3007_v24  ;;  %2601 = vmatpush3.xpose.msra.mxu1 %v2950_v50  ;;  %v3593_v24 = vld [vmem:[#allocation25_spill] sm:$0xff] }
  0x72   :  { %2550 = vmatprep.subr.mxu0 %v3022_v36  ;;  %2602 = vmatprep.subr.mxu1 %v2965_v57  ;;  %v3600_v43 = vand.u32 4294901760, %v3593_v24 }
  0x75   :  { %2551 = vmatpush3.xpose.msra.mxu0 %v3022_v36  ;;  %2603 = vmatpush3.xpose.msra.mxu1 %v2965_v57  ;;  %v3594_v36 = vld [vmem:[#allocation26_spill] sm:$0xff] }
  0x76   :  { %2552 = vmatprep.subr.mxu0 %v3037_v49  ;;  %2604 = vmatprep.subr.mxu1 %v2980_v63  ;;  %v3601_v60 = vand.u32 4294901760, %v3594_v36 }
  0x79   :  { %2553 = vmatpush3.xpose.msra.mxu0 %v3037_v49  ;;  %2605 = vmatpush3.xpose.msra.mxu1 %v2980_v63  ;;  %v3595_v49 = vld [vmem:[#allocation7_spill] sm:$0xff] }
  0x7a   :  { %2554 = vmatprep.subr.mxu0 %v3049_v55  ;;  %2606 = vmatprep.subr.mxu1 %v2995_v16 }
  0x7d   :  { %2555 = vmatpush3.xpose.msra.mxu0 %v3049_v55  ;;  %2607 = vmatpush3.xpose.msra.mxu1 %v2995_v16  ;;  %v3596_v55 = vld [vmem:[#allocation28_spill] sm:$0xff] }
  0x7e   :  { %2556 = vmatprep.subr.mxu0 %v3083_v45  ;;  %2608 = vmatprep.subr.mxu1 %v3587_v40 }
  0x81   :  { %2557 = vmatpush3.xpose.msra.mxu0 %v3083_v45  ;;  %2609 = vmatpush3.xpose.msra.mxu1 %v3587_v40  ;;  %v3597_v45 = vand.u32 4294901760, %v3590_v56 }
  0x82   :  { %2610 = vmatprep.subr.mxu1 %v3588_v41  ;;  %2638 = vmatprep.subr.mxu0 %v3589_v48 }
  0x84   :  { %2559 = vmatmul.mubr.f32.vlgmr.msra.gmra.mxu0 %v3590_v56 }
  0x85   :  { %2611 = vmatpush3.xpose.msra.mxu1 %v3588_v41  ;;  %2639 = vmatpush3.xpose.msra.mxu0 %v3589_v48 }
  0x86   :  { %2612 = vmatprep.subr.mxu1 %v3591_v62  ;;  %2640 = vmatprep.subr.mxu0 %v3592_v7 }
  0x87   :  { %2561 = vmatprep.mubr.f32.mxu0 %v3593_v24 }
  0x88   :  { %2562 = vmatmul.mubr.f32.gmra.mxu0 %v3594_v36 }
  0x89   :  { %2613 = vmatpush3.xpose.msra.mxu1 %v3591_v62  ;;  %2641 = vmatpush3.xpose.msra.mxu0 %v3592_v7 }
  0x8a   :  { %2642 = vmatprep.subr.mxu0 %v3595_v49  ;;  %2694 = vmatprep.subr.mxu1 %v2829_v3 }
  0x8b   :  { %2564 = vmatprep.mubr.f32.mxu0 %v3596_v55 }
  0x8c   :  { %2615 = vmatmul.mubr.f32.vlgmr.msra.gmra.mxu1 %v3597_v45  ;;  %2565 = vmatmul.mubr.f32.gmra.mxu0 %v3598_v31 }
  0x8d   :  { %2643 = vmatpush3.xpose.msra.mxu0 %v3595_v49  ;;  %2695 = vmatpush3.xpose.msra.mxu1 %v2829_v3  ;;  %v3603_v3 = vand.u32 4294901760, %v3596_v55 }
  0x8e   :  { %2644 = vmatprep.subr.mxu0 %v3599_v17  ;;  %2696 = vmatprep.subr.mxu1 %v2831_v4 }
  0x8f   :  { %2617 = vmatprep.mubr.f32.mxu1 %v3600_v43  ;;  %2567 = vmatprep.mubr.f32.mxu0 %v3135_v29 }
  0x90   :  { %2618 = vmatmul.mubr.f32.gmra.mxu1 %v3601_v60  ;;  %2568 = vmatmul.mubr.f32.gmra.mxu0 %v3138_v58  ;;  %v3611_v58 = vld [vmem:[#allocation13_spill] sm:$0xff] }
  0x91   :  { %2645 = vmatpush3.xpose.msra.mxu0 %v3599_v17  ;;  %2697 = vmatpush3.xpose.msra.mxu1 %v2831_v4  ;;  %v3606_v4 = vand.u32 4294901760, %v3135_v29  ;;  %v3610_v29 = vand.u32 4294901760, %v3174_v53 }
  0x92   :  { %2646 = vmatprep.subr.mxu0 %v3602_v59  ;;  %2698 = vmatprep.subr.mxu1 %v2833_v5 }
  0x93   :  { %2620 = vmatprep.mubr.f32.mxu1 %v3603_v3  ;;  %2570 = vmatprep.mubr.f32.mxu0 %v3166_v0 }
  0x94   :  { %2621 = vmatmul.mubr.f32.gmra.mxu1 %v3604_v1  ;;  %2571 = vmatmul.mubr.f32.gmra.mxu0 %v3174_v53  ;;  %v1342_v53 = vld [vmem:[%s3495_s2] sm:$0xff] }
  0x95   :  { %2647 = vmatpush3.xpose.msra.mxu0 %v3602_v59  ;;  %2699 = vmatpush3.xpose.msra.mxu1 %v2833_v5  ;;  %v3609_v5 = vand.u32 4294901760, %v3166_v0  ;;  %v3613_v0 = vld [vmem:[#allocation14_spill] sm:$0xff] }
  0x96   :  { %2648 = vmatprep.subr.mxu0 %v3605_v21  ;;  %2700 = vmatprep.subr.mxu1 %v2841_v8 }
  0x97   :  { %2623 = vmatprep.mubr.f32.mxu1 %v3606_v4  ;;  %2573 = vmatprep.mubr.f32.mxu0 %v3194_v9  ;;  %v1493_v9 = vld [vmem:[%s3497_s4] sm:$0xff] }
  0x98   :  { %2624 = vmatmul.mubr.f32.gmra.mxu1 %v3607_v11  ;;  %2574 = vmatmul.mubr.f32.gmra.mxu0 %v3200_v26 }
  0x99   :  { %2649 = vmatpush3.xpose.msra.mxu0 %v3605_v21  ;;  %2701 = vmatpush3.xpose.msra.mxu1 %v2841_v8  ;;  %v3612_v8 = vand.u32 4294901760, %v3200_v26  ;;  %v2782_v26 = vmov 0  }
  0x9a   :  { %2650 = vmatprep.subr.mxu0 %v3608_v30  ;;  %2702 = vmatprep.subr.mxu1 %v2854_v12 }
  0x9b   :  { %2626 = vmatprep.mubr.f32.mxu1 %v3609_v5  ;;  %2576 = vmatprep.mubr.f32.mxu0 %v3218_v28 }
  0x9c   :  { %2627 = vmatmul.mubr.f32.gmra.mxu1 %v3610_v29  ;;  %2577 = vmatmul.mubr.f32.gmra.mxu0 %v3228_v23 }
  0x9d   :  { %2651 = vmatpush3.xpose.msra.mxu0 %v3608_v30  ;;  %2703 = vmatpush3.xpose.msra.mxu1 %v2854_v12  ;;  %v3614_v12 = vld [vmem:[#allocation10_spill] sm:$0xff] }
  0x9e   :  { %2652 = vmatprep.subr.mxu0 %v3611_v58  ;;  %2704 = vmatprep.subr.mxu1 %v2877_v20 }
  0x9f   :  { %2629 = vmatprep.mubr.f32.mxu1 %v239_v54  ;;  %2579 = vmatprep.mubr.f32.mxu0 %v3242_v37  ;;  %v3617_v37 = vld [vmem:[#allocation18_spill] sm:$0xff] }
  0xa0   :  { %2630 = vmatmul.mubr.f32.gmra.mxu1 %v3612_v8  ;;  %2580 = vmatmul.mubr.f32.gmra.mxu0 %v3250_v38  ;;  %v3619_v54 = vld [vmem:[#allocation22_spill] sm:$0xff] }
  0xa1   :  { %2653 = vmatpush3.xpose.msra.mxu0 %v3611_v58  ;;  %2705 = vmatpush3.xpose.msra.mxu1 %v2877_v20  ;;  %v3615_v20 = vld [vmem:[#allocation15_spill] sm:$0xff] }
  0xa2   :  { %2654 = vmatprep.subr.mxu0 %v3613_v0  ;;  %2706 = vmatprep.subr.mxu1 %v2892_v27 }
  0xa3   :  { %2632 = vmatprep.mubr.f32.mxu1 %v259_v14  ;;  %2670 = vmatprep.mubr.f32.mxu0 %v3614_v12 }
  0xa4   :  { %2633 = vmatmul.mubr.f32.gmra.mxu1 %v269_v18  ;;  %2755 = vset.pattern.permute.xlu0 %v2782_v26 }
  0xa5   :  { %2655 = vmatpush3.xpose.msra.mxu0 %v3613_v0  ;;  %2707 = vmatpush3.xpose.msra.mxu1 %v2892_v27  ;;  %v3616_v27 = vld [vmem:[#allocation16_spill] sm:$0xff] }
  0xa6   :  { %2656 = vmatprep.subr.mxu0 %v3615_v20  ;;  %2708 = vmatprep.subr.mxu1 %v2910_v34 }
  0xa7   :  { %2635 = vmatprep.mubr.f32.mxu1 %v279_v15  ;;  %1361 = vperm.xlu0 %2755, %v1342_v53  }
  0xa8   :  { %2636 = vmatmul.mubr.f32.gmra.mxu1 %v289_v46 }
  0xa9   :  { %2657 = vmatpush3.xpose.msra.mxu0 %v3615_v20  ;;  %2709 = vmatpush3.xpose.msra.mxu1 %v2910_v34  ;;  %v3618_v34 = vld [vmem:[#allocation20_spill] sm:$0xff] }
  0xaa   :  { %2658 = vmatprep.subr.mxu0 %v3616_v27  ;;  %2710 = vmatprep.subr.mxu1 %v2931_v42 }
  0xab   :  { %2726 = vmatprep.mubr.f32.mxu1 %v3614_v12  ;;  %1511 = vperm.xlu0 %2755, %v1493_v9  }
  0xad   :  { %2659 = vmatpush3.xpose.msra.mxu0 %v3616_v27  ;;  %2711 = vmatpush3.xpose.msra.mxu1 %v2931_v42  ;;  %v3620_v42 = vld [vmem:[#allocation24_spill] sm:$0xff] }
  0xae   :  { %2660 = vmatprep.subr.mxu0 %v3617_v37  ;;  %2712 = vmatprep.subr.mxu1 %v2950_v50 }
  0xb1   :  { %2661 = vmatpush3.xpose.msra.mxu0 %v3617_v37  ;;  %2713 = vmatpush3.xpose.msra.mxu1 %v2950_v50  ;;  %v3621_v50 = vld [vmem:[#allocation27_spill] sm:$0xff] }
  0xb2   :  { %2662 = vmatprep.subr.mxu0 %v3618_v34  ;;  %2714 = vmatprep.subr.mxu1 %v2965_v57 }
  0xb5   :  { %2663 = vmatpush3.xpose.msra.mxu0 %v3618_v34  ;;  %2715 = vmatpush3.xpose.msra.mxu1 %v2965_v57 }
  0xb6   :  { %2664 = vmatprep.subr.mxu0 %v3619_v54  ;;  %2716 = vmatprep.subr.mxu1 %v2980_v63 }
  0xb9   :  { %2665 = vmatpush3.xpose.msra.mxu0 %v3619_v54  ;;  %2717 = vmatpush3.xpose.msra.mxu1 %v2980_v63 }
  0xba   :  { %2666 = vmatprep.subr.mxu0 %v3620_v42  ;;  %2718 = vmatprep.subr.mxu1 %v2995_v16 }
  0xbd   :  { %2667 = vmatpush3.xpose.msra.mxu0 %v3620_v42  ;;  %2719 = vmatpush3.xpose.msra.mxu1 %v2995_v16 }
  0xbe   :  { %2668 = vmatprep.subr.mxu0 %v3621_v50  ;;  %2720 = vmatprep.subr.mxu1 %v3587_v40 }
  0xc1   :  { %2669 = vmatpush3.xpose.msra.mxu0 %v3621_v50  ;;  %2721 = vmatpush3.xpose.msra.mxu1 %v3587_v40 }
  0xc2   :  { %2722 = vmatprep.subr.mxu1 %v3588_v41 }
  0xc4   :  { %2671 = vmatmul.mubr.f32.vlgmr.msra.gmra.mxu0 %v3042_v52 }
  0xc5   :  { %2723 = vmatpush3.xpose.msra.mxu1 %v3588_v41  ;;  %2673 = vmatprep.mubr.f32.mxu0 %v3062_v6 }
  0xc6   :  { %2724 = vmatprep.subr.mxu1 %v3591_v62 }
  0xc8   :  { %2674 = vmatmul.mubr.f32.gmra.mxu0 %v3067_v19 }
  0xc9   :  { %2725 = vmatpush3.xpose.msra.mxu1 %v3591_v62  ;;  %2676 = vmatprep.mubr.f32.mxu0 %v3088_v44 }
  0xcc   :  { %2727 = vmatmul.mubr.f32.vlgmr.msra.gmra.mxu1 %v3042_v52  ;;  %2677 = vmatmul.mubr.f32.gmra.mxu0 %v3100_v51 }
  0xcd   :  { %2729 = vmatprep.mubr.f32.mxu1 %v3062_v6  ;;  %2679 = vmatprep.mubr.f32.mxu0 %v3109_v35 }
  0xd0   :  { %2730 = vmatmul.mubr.f32.gmra.mxu1 %v3067_v19  ;;  %2680 = vmatmul.mubr.f32.gmra.mxu0 %v3111_v61 }
  0xd1   :  { %2732 = vmatprep.mubr.f32.mxu1 %v3088_v44  ;;  %2682 = vmatprep.mubr.f32.mxu0 %v3144_v25 }
  0xd4   :  { %2733 = vmatmul.mubr.f32.gmra.mxu1 %v3100_v51  ;;  %2683 = vmatmul.mubr.f32.gmra.mxu0 %v3150_v47 }
  0xd5   :  { %2735 = vmatprep.mubr.f32.mxu1 %v3109_v35  ;;  %2685 = vmatprep.mubr.f32.mxu0 %v3168_v22 }
  0xd8   :  { %2736 = vmatmul.mubr.f32.gmra.mxu1 %v3111_v61  ;;  %2686 = vmatmul.mubr.f32.gmra.mxu0 %v3176_v2 }
  0xd9   :  { %2738 = vmatprep.mubr.f32.mxu1 %v3144_v25  ;;  %2688 = vmatprep.mubr.f32.mxu0 %v3196_v39 }
  0xdc   :  { %2739 = vmatmul.mubr.f32.gmra.mxu1 %v3150_v47  ;;  %2689 = vmatmul.mubr.f32.gmra.mxu0 %v3202_v13 }
  0xdd   :  { %2741 = vmatprep.mubr.f32.mxu1 %v3168_v22  ;;  %2691 = vmatprep.mubr.f32.mxu0 %v3220_v10 }
  0xe0   :  { %2742 = vmatmul.mubr.f32.gmra.mxu1 %v3176_v2  ;;  %2692 = vmatmul.mubr.f32.gmra.mxu0 %v3230_v33 }
  0xe1   :  { %2744 = vmatprep.mubr.f32.mxu1 %v3196_v39 }
  0xe4   :  { %2745 = vmatmul.mubr.f32.gmra.mxu1 %v3202_v13 }
  0xe5   :  { %2747 = vmatprep.mubr.f32.mxu1 %v3220_v10 }
  0xe8   :  { %2748 = vmatmul.mubr.f32.gmra.mxu1 %v3230_v33 }
 0x104   :  { %v2448_v25 = vpop.f32.mrf.mxu0 }
 0x106   :  { %v143_v35 = vpop.f32.mrf.mxu0 }
 0x108   :  { %v2451_v57 = vpop.f32.mrf.mxu0 }
 0x10a   :  { %v163_v63 = vpop.f32.mrf.mxu0 }
 0x10c   :  { %v2504_v16 = vpop.f32.mrf.mxu1  ;;  %v2454_v52 = vpop.f32.mrf.mxu0 }
 0x10d   :  { %v1579_v52 = vlaneseq }
 0x10e   :  { %v444_v6 = vpop.f32.mrf.mxu1  ;;  %v183_v19 = vpop.f32.mrf.mxu0 }
 0x10f   :  { %v445_v44 = vadd.f32 %v444_v6, %v143_v35  ;;  %v1580_v19 = vshrl.u32 %v1579_v52, 7 }
 0x110   :  { %v2507_v2 = vpop.f32.mrf.mxu1  ;;  %v2457_v61 = vpop.f32.mrf.mxu0 }
 0x112   :  { %v456_v51 = vpop.f32.mrf.mxu1  ;;  %v203_v47 = vpop.f32.mrf.mxu0 }
 0x113   :  { %v2221_v51 = vld [vmem:[%s3498_s5] ss:$0 sm:$0xff] }
 0x114   :  { %v2510_v39 = vpop.f32.mrf.mxu1  ;;  %v2460_v22 = vpop.f32.mrf.mxu0 }
 0x116   :  { %v468_v13 = vpop.f32.mrf.mxu1  ;;  %v223_v28 = vpop.f32.mrf.mxu0 }
 0x117   :  { %v2220_v28 = vld [vmem:[%s3496_s3] ss:$0 sm:$0xff]  ;;  %s2784_s3 = smov [#allocation2]  }
 0x118   :  { %v2513_v10 = vpop.f32.mrf.mxu1  ;;  %v2463_v46 = vpop.f32.mrf.mxu0  ;;  %s2212_s5 = sshll.u32 %s2784_s3, 4  ;;  %s2213_s5 = int_to_ptr.vmem [resolvable:$true] %s2212_s5 }
 0x119   :  { %s2760_s17 = scalar_lea.vmem %s2213_s5, 16  ;;  %s2764_s18 = scalar_lea.vmem %s2213_s5, 32 }
 0x11a   :  { %v480_v23 = vpop.f32.mrf.mxu1  ;;  %v243_v33 = vpop.f32.mrf.mxu0  ;;  %p2761_p0 = scmp.ne.s32.totalorder %s2213_s5, %s2760_s17  ;;  %p2765_p1 = scmp.lt.s32.totalorder %s2213_s5, %s2213_s5 }
 0x11b   :  { %p2766_p2 = scmp.lt.s32.totalorder %s2764_s18, %s2760_s17 }
 0x11c   :  { %v2516_v14 = vpop.f32.mrf.mxu1  ;;  %v2466_v18 = vpop.f32.mrf.mxu0 }
 0x11d   :  { %p2767_p3 = por %p2766_p2, %p2765_p1 }
 0x11e   :  { %v492_v38 = vpop.f32.mrf.mxu1  ;;  %v263_v15 = vpop.f32.mrf.mxu0 }
 0x11f   :  { %p2768_p4 = pnand %p2767_p3, %p2761_p0 }
 0x120   :  { %v2519_v32 = vpop.f32.mrf.mxu1  ;;  %v2469_v40 = vpop.f32.mrf.mxu0 }
 0x122   :  { %v504_v41 = vpop.f32.mrf.mxu1  ;;  %v283_v48 = vpop.f32.mrf.mxu0 }
 0x123   :  { %v1362_v63 = vpop.permute.xlu0 %1361 }
 0x124   :  { %v2522_v56 = vpop.f32.mrf.mxu1  ;;  %v1445_v18 = vadd.f32 %v2220_v28, %v1362_v63 }
 0x126   :  { %v516_v62 = vpop.f32.mrf.mxu1 }
 0x127   :  { %v1512_v47 = vpop.permute.xlu0 %1511 }
 0x128   :  { %v2525_v7 = vpop.f32.mrf.mxu1  ;;  %vm1562_vm1 = vcmp.eq.s32.totalorder %v1512_v47, %v2221_v51 }
 0x129   :  { %vm1874_vm6 = vmxor %vm1562_vm1, %vm2783_vm5 }
 0x12a   :  { %v528_v24 = vpop.f32.mrf.mxu1 }
 0x144   :  { %v2560_v36 = vpop.f32.mrf.mxu0 }
 0x146   :  { %v638_v49 = vpop.f32.mrf.mxu0 }
 0x147   :  { %v639_v55 = vadd.f32 %v638_v49, %v445_v44  ;;  %v1614_v44 = vand.u32 127, %v1579_v52 }
 0x148   :  { %v2563_v45 = vpop.f32.mrf.mxu0 }
 0x149   :  { %vm1616_vm0 = vcmp.ne.s32.totalorder %v1580_v19, %v1614_v44  ;;  %vm1615_vm3 = vcmp.lt.s32.totalorder %v1614_v44, 8 }
 0x14a   :  { %v652_v31 = vpop.f32.mrf.mxu0  ;;  %vm1632_vm2 = vmand %vm1562_vm1, %vm1616_vm0 }
 0x14b   :  { %vm1650_vm4 = vmand %vm1632_vm2, %vm1615_vm3 }
 0x14c   :  { %v2616_v17 = vpop.f32.mrf.mxu1  ;;  %v2566_v43 = vpop.f32.mrf.mxu0  ;;  %vm1890_vm7 = vmand %vm1874_vm6, %vm1615_vm3 }
 0x14e   :  { %v832_v60 = vpop.f32.mrf.mxu1  ;;  %v666_v59 = vpop.f32.mrf.mxu0 }
 0x14f   :  { %v833_v61 = vadd.f32 %v832_v60, %v639_v55 }
 0x150   :  { %v2619_v3 = vpop.f32.mrf.mxu1  ;;  %v2569_v1 = vpop.f32.mrf.mxu0 }
 0x152   :  { %v848_v21 = vpop.f32.mrf.mxu1  ;;  %v680_v4 = vpop.f32.mrf.mxu0 }
 0x154   :  { %v2622_v11 = vpop.f32.mrf.mxu1  ;;  %v2572_v30 = vpop.f32.mrf.mxu0 }
 0x156   :  { %v864_v5 = vpop.f32.mrf.mxu1  ;;  %v694_v29 = vpop.f32.mrf.mxu0 }
 0x158   :  { %v2625_v58 = vpop.f32.mrf.mxu1  ;;  %v2575_v8 = vpop.f32.mrf.mxu0 }
 0x15a   :  { %v880_v0 = vpop.f32.mrf.mxu1  ;;  %v708_v12 = vpop.f32.mrf.mxu0 }
 0x15c   :  { %v2628_v26 = vpop.f32.mrf.mxu1  ;;  %v2578_v53 = vpop.f32.mrf.mxu0 }
 0x15e   :  { %v896_v20 = vpop.f32.mrf.mxu1  ;;  %v722_v9 = vpop.f32.mrf.mxu0 }
 0x160   :  { %v2631_v27 = vpop.f32.mrf.mxu1  ;;  %v2581_v37 = vpop.f32.mrf.mxu0 }
 0x162   :  { %v912_v34 = vpop.f32.mrf.mxu1  ;;  %v736_v54 = vpop.f32.mrf.mxu0 }
 0x164   :  { %v2634_v42 = vpop.f32.mrf.mxu1 }
 0x166   :  { %v928_v50 = vpop.f32.mrf.mxu1 }
 0x168   :  { %v2637_v25 = vpop.f32.mrf.mxu1 }
 0x16a   :  { %v944_v35 = vpop.f32.mrf.mxu1 }
 0x184   :  { %v2672_v57 = vpop.f32.mrf.mxu0 }
 0x186   :  { %v1071_v16 = vpop.f32.mrf.mxu0 }
 0x187   :  { %v1072_v13 = vadd.f32 %v1071_v16, %v833_v61 }
 0x188   :  { %v2675_v6 = vpop.f32.mrf.mxu0 }
 0x18a   :  { %v1083_v2 = vpop.f32.mrf.mxu0 }
 0x18c   :  { %v2728_v39 = vpop.f32.mrf.mxu1  ;;  %v2678_v22 = vpop.f32.mrf.mxu0 }
 0x18e   :  { %v1248_v10 = vpop.f32.mrf.mxu1  ;;  %v1095_v46 = vpop.f32.mrf.mxu0 }
 0x18f   :  { %v1249_v23 = vadd.f32 %v1248_v10, %v1072_v13 }
 0x190   :  { %v2731_v33 = vpop.f32.mrf.mxu1  ;;  %v2681_v14 = vpop.f32.mrf.mxu0 }
 0x191   :  { %v1461_v38 = vmul.f32 2.0, %v1249_v23 }
 0x192   :  { %v1260_v15 = vpop.f32.mrf.mxu1  ;;  %v1107_v32 = vpop.f32.mrf.mxu0 }
 0x193   :  { %v1477_v40 = vsub.f32 %v1445_v18, %v1461_v38 }
 0x194   :  { %v2734_v41 = vpop.f32.mrf.mxu1  ;;  %v2684_v48 = vpop.f32.mrf.mxu0 }
 0x195   :  { %v1666_v56 = vsel %vm1650_vm4, %v1477_v40, -inf  ;;  %v1906_v49 = vsel %vm1890_vm7, %v1477_v40, inf }
 0x196   :  { %1682 = vmax.xlane.f32.xlu1 %v1666_v56  ;;  %v1272_v62 = vpop.f32.mrf.mxu1  ;;  %v1119_v7 = vpop.f32.mrf.mxu0 }
 0x198   :  { %v2737_v24 = vpop.f32.mrf.mxu1  ;;  %v2687_v36 = vpop.f32.mrf.mxu0 }
 0x19a   :  { %1922 = vmin.xlane.f32.xlu1 %v1906_v49  ;;  %v1284_v55 = vpop.f32.mrf.mxu1  ;;  %v1131_v45 = vpop.f32.mrf.mxu0 }
 0x19c   :  { %v2740_v31 = vpop.f32.mrf.mxu1  ;;  %v2690_v17 = vpop.f32.mrf.mxu0 }
 0x19e   :  { %v1296_v43 = vpop.f32.mrf.mxu1  ;;  %v1143_v60 = vpop.f32.mrf.mxu0 }
 0x1a0   :  { %v2743_v59 = vpop.f32.mrf.mxu1  ;;  %v2693_v3 = vpop.f32.mrf.mxu0 }
 0x1a2   :  { %v1308_v1 = vpop.f32.mrf.mxu1  ;;  %v1155_v21 = vpop.f32.mrf.mxu0 }
 0x1a4   :  { %v2746_v4 = vpop.f32.mrf.mxu1 }
 0x1a6   :  { %v1320_v11 = vpop.f32.mrf.mxu1 }
 0x1a8   :  { %v2749_v30 = vpop.f32.mrf.mxu1 }
 0x1aa   :  { %v1332_v5 = vpop.f32.mrf.mxu1 }
 0x21f   :  { %v1683_v29 = vpop.xlane.xlu1 %1682 }
 0x220   :  { %v1730_v58 = vmax.f32 %v1683_v29, 1e-12  ;;  %vm1714_vm11 = vcmp.gt.f32.partialorder %v1683_v29, -inf }
 0x222   :  { %2756 = vrsqrt.f32 %v1730_v58  ;;  %vm1748_vm8 = vcmp.eq.f32.partialorder %v1730_v58, inf  ;;  %v1751_v20 = vand.u32 2147483648, %v1730_v58  ;;  %vm1750_vm9 = vcmp.eq.f32.partialorder %v1730_v58, 0.0 }
 0x223   :  { %v1923_v8 = vpop.xlane.xlu1 %1922 }
 0x224   :  { %v1954_v0 = vmax.f32 %v1923_v8, 1e-12 }
 0x226   :  { %2758 = vrsqrt.f32 %v1954_v0  ;;  %vm1972_vm10 = vcmp.eq.f32.partialorder %v1954_v0, inf  ;;  %v1975_v34 = vand.u32 2147483648, %v1954_v0  ;;  %vm1974_vm12 = vcmp.eq.f32.partialorder %v1954_v0, 0.0 }
 0x22f   :  { %v2757_v12 = vpop.eup %2756 }
 0x230   :  { %v1747_v26 = vmul.f32 %v2757_v12, %v1730_v58 }
 0x232   :  { %v1749_v53 = vsel %vm1748_vm8, %v1730_v58, %v1747_v26 }
 0x233   :  { %v2759_v9 = vpop.eup %2758  ;;  %v1752_v27 = vsel %vm1750_vm9, %v1751_v20, %v1749_v53 }
 0x234   :  { %v1971_v37 = vmul.f32 %v2759_v9, %v1954_v0  ;;  %v1858_v42 = vsel %vm1714_vm11, %v1752_v27, 0.0 }
 0x236   :  { %v1973_v54 = vsel %vm1972_vm10, %v1954_v0, %v1971_v37 }
 0x237   :  { %v1976_v50 = vsel %vm1974_vm12, %v1975_v34, %v1973_v54 }
 0x238   :  { %v2082_v25 = vsub.f32 %v1858_v42, %v1976_v50 }
 0x23a   :  { %v2098_v35 = vadd.f32 0.3, %v2082_v25 }
 0x23c   :  { %v2114_v57 = vmax.f32 %v2098_v35, 0.0 }
 0x23e   :  { %v2163_v63 = vsel %vm2162_vm13, %v2114_v57, 0.0 }
 0x23f   :  { %2194 = vadd.xlane.f32.xlu0 %v2163_v63 }
 0x2c8   :  { %v2195_v16 = vpop.xlane.xlu0 %2194 }
 0x2c9   :  { %v2196_v52 = vrot.slane %v2195_v16, 4 }
 0x2cb   :  { %v2197_v6 = vadd.f32 %v2196_v52, %v2195_v16 }
 0x2cd   :  { %v2198_v19 = vrot.slane %v2197_v6, 2 }
 0x2cf   :  { %v2199_v44 = vadd.f32 %v2198_v19, %v2197_v6 }
 0x2d1   :  { %v2200_v2 = vrot.slane %v2199_v44, 1 }
 0x2d3   :  { %v2201_v61 = vadd.f32 %v2200_v2, %v2199_v44 }
 0x2d5   :  { %2750 = vpush %v2201_v61 }
 0x306   :  { %s2751_s16 = spop %2750 }
 0x307   :  { %v2203_v51 = vstv %s2751_s16 }
 0x308   :  { %2205 = vst.msk [vmem:[#allocation2] sm:$0x1] %vm2204_vm14, %v2203_v51 }
 0x309   :  { %2771 = shalt.err (!%p2768_p4)
}
 0x30a   :  { %2215 = dma.vmem_to_hbm [thread:$0]  %s2213_s5, 16, %s3499_s6, [#allocation3]  }
 0x30b   :  { %2780 = dma.done.wait [#allocation3], 16  }
 0x30c   :  { %2781 = vsyncadd [#allocation3], 4294967280 }
 0x30d   :  { %2219 = vsyncpa [#allocation3], 1 }

</bundles_post_ra>
